<compile_context>
chip_gen: v6e
topology: v6e:2x2x1
jax: 0.10.0
libtpu: 0.0.40
codegen_flags: <defaults>
</compile_context>

<pallas_src>
import functools

import jax
import jax.numpy as jnp
from jax.experimental import pallas as pl
from jax.experimental.pallas import tpu as pltpu


# --------------------------------------------------------------------------
# Kernels
# --------------------------------------------------------------------------
def _head_kernel(x_ref, w_ref, b_ref, o_ref):
    # Single-K-block path: x (tm, E) @ w (E, tn) + b (1, tn) -> o (tm, tn).
    acc = jnp.dot(x_ref[...], w_ref[...], preferred_element_type=jnp.float32)
    o_ref[...] = (acc + b_ref[...]).astype(o_ref.dtype)


def _head_kernel_ksplit(x_ref, w_ref, b_ref, o_ref, acc_ref):
    # K-split path: f32 accumulator in VMEM scratch, K is the last grid axis.
    k = pl.program_id(2)

    @pl.when(k == 0)
    def _():
        acc_ref[...] = jnp.zeros_like(acc_ref)

    acc_ref[...] += jnp.dot(x_ref[...], w_ref[...],
                            preferred_element_type=jnp.float32)

    @pl.when(k == pl.num_programs(2) - 1)
    def _():
        o_ref[...] = (acc_ref[...] + b_ref[...]).astype(o_ref.dtype)


# --------------------------------------------------------------------------
# Wrapper-side helpers
# --------------------------------------------------------------------------
def _vmem_budget_bytes():
    """Generation-aware VMEM cap (leave headroom for Mosaic scratch/sems)."""
    try:
        cap = pltpu.get_tpu_info().vmem_capacity_bytes
    except Exception:
        cap = 64 << 20  # unknown -> assume the smallest (v7x per-TC)
    if cap <= (64 << 20):
        return 44 << 20  # v7x: 64 MiB physical per TensorCore
    return 96 << 20      # v5e / v6e: 128 MiB physical


def _auto_tk(E, tm, tn, in_isz, out_isz, budget):
    """Largest tk (dividing E exactly, lane-aligned) whose double-buffered
    blocks fit the VMEM budget.  tk == E means no K-split."""

    def need(tk):
        return (2 * tm * tk * in_isz            # x blocks (double-buffered)
                + 2 * tk * tn * in_isz          # weight blocks
                + 2 * tn * 4                    # bias blocks
                + 2 * tm * tn * out_isz         # output blocks
                + (tm * tn * 4 if tk < E else 0))  # f32 accumulator scratch

    if need(E) <= budget:
        return E
    cands = [d for d in range(128, E, 128) if E % d == 0]
    for tk in sorted(cands, reverse=True):
        if need(tk) <= budget:
            return tk
    # Nothing fits -> best effort: split as finely as legality allows.
    # TODO(synk): also shrink tn here instead of relying on the compiler.
    return cands[0] if cands else E


def prepare_head_params(weight, bias, compute_dtype=jnp.bfloat16):
    """One-time (parameter-load) prep.

    weight: (V, E) -> returned pre-transposed (E, V) in `compute_dtype`
    bias:   (V,)   -> returned as f32 (1, V)

    Do this once per parameter update / expand(), NOT per forward call, so the
    hot path does not re-materialize a casted weight copy in HBM.
    """
    w_t = jnp.asarray(weight).T.astype(compute_dtype)              # (E, V)
    b_row = jnp.asarray(bias).astype(jnp.float32).reshape(1, -1)   # (1, V)
    return w_t, b_row


# --------------------------------------------------------------------------
# Forward
# --------------------------------------------------------------------------
@functools.partial(jax.jit, static_argnames=("tm", "tn", "tk"))
def expandable_linear_head_forward(x, w_t, b_row, *, tm=256, tn=1024, tk=None):
    """y = x @ weight.T + bias with pre-prepared params.

    x:     (..., E) float
    w_t:   (E, V)   compute dtype (from prepare_head_params)
    b_row: (1, V)   f32
    returns (..., V) in x.dtype (f32 accumulation + f32 bias add; bf16-compute
    numerics relative to a pure-f32 F.linear).
    """
    *lead, E = x.shape
    E_w, V = w_t.shape
    assert E_w == E, "weight embed dim must match x"
    assert b_row.shape == (1, V), "bias must be prepared as (1, V)"
    out_dtype = x.dtype
    compute_dtype = w_t.dtype

    M = 1
    for d in lead:
        M *= d

    x2d = x.reshape(M, E)
    if x2d.dtype != compute_dtype:
        x2d = x2d.astype(compute_dtype)  # small (M*E) per-call cast only

    # ---- tile selection (trace-time; shapes are static under jit) ----------
    if M <= tm:
        tm_eff = M                     # full-dim block (legal at any size)
    else:
        assert tm % 16 == 0, "tm must be a multiple of 16 when tiling M"
        tm_eff = tm
    if V <= tn:
        tn_eff = V                     # full-dim block
    else:
        assert tn % 128 == 0, "tn must be a multiple of 128 when tiling V"
        tn_eff = tn

    in_isz = jnp.dtype(compute_dtype).itemsize
    out_isz = jnp.dtype(out_dtype).itemsize
    budget = _vmem_budget_bytes()

    if tk is None:
        tk = _auto_tk(E, tm_eff, tn_eff, in_isz, out_isz, budget)
    assert tk == E or (E % tk == 0 and tk % 128 == 0), (
        "tk must divide E exactly and be a multiple of 128 (or equal E)")

    grid_m = pl.cdiv(M, tm_eff)
    grid_n = pl.cdiv(V, tn_eff)
    grid_k = E // tk

    # ---- loop order: the re-read operand should be the smaller one ---------
    v_outer = M <= V  # decode/serving: weight (V*E) resident, x (M*E) re-read
    if v_outer:
        grid = (grid_n, grid_m, grid_k)
        x_map = lambda j, i, k: (i, k)
        w_map = lambda j, i, k: (k, j)     # independent of inner i -> resident
        b_map = lambda j, i, k: (0, j)
        o_map = lambda j, i, k: (i, j)
    else:
        grid = (grid_m, grid_n, grid_k)
        x_map = lambda i, j, k: (i, k)     # independent of inner j -> resident
        w_map = lambda i, j, k: (k, j)
        b_map = lambda i, j, k: (0, j)
        o_map = lambda i, j, k: (i, j)

    if grid_k == 1:
        kernel = _head_kernel
        scratch = ()
    else:
        kernel = _head_kernel_ksplit
        scratch = (pltpu.VMEM((tm_eff, tn_eff), jnp.float32),)

    out2d = pl.pallas_call(
        kernel,
        out_shape=jax.ShapeDtypeStruct((M, V), out_dtype),
        grid_spec=pltpu.PrefetchScalarGridSpec(
            num_scalar_prefetch=0,
            grid=grid,
            in_specs=[
                pl.BlockSpec((tm_eff, tk), x_map),      # activations
                pl.BlockSpec((tk, tn_eff), w_map),      # weight (E, V) layout
                pl.BlockSpec((1, tn_eff), b_map),       # bias row
            ],
            out_specs=pl.BlockSpec((tm_eff, tn_eff), o_map),
            scratch_shapes=scratch,
        ),
        compiler_params=pltpu.CompilerParams(
            # Only the outer axis is "parallel": 2-TC parts shard the
            # resident-operand axis and do not duplicate the big HBM stream.
            dimension_semantics=("parallel", "arbitrary", "arbitrary"),
            vmem_limit_bytes=int(budget)),
    )(x2d, w_t, b_row)

    return out2d.reshape(*lead, V)


def expandable_linear_head(x, weight, bias, **tile_kwargs):
    """Convenience one-shot call matching the PyTorch module signature
    (weight (V, E), bias (V,)).  Prefer prepare_head_params + *_forward in a
    real serving loop so the weight cast/transpose happens once."""
    w_t, b_row = prepare_head_params(weight, bias)
    return expandable_linear_head_forward(x, w_t, b_row, **tile_kwargs)


# --------------------------------------------------------------------------
# Self-test
# --------------------------------------------------------------------------
if __name__ == "__main__":
    batch, seq, embed_dim, vocab_size = 2, 8, 32, 256

    key = jax.random.PRNGKey(0)
    kx, kw, kx2, kw2, kx3, kw3 = jax.random.split(key, 6)

    # ---- 1) default config, module-style init (bias = zeros) ---------------
    x = jax.random.normal(kx, (batch, seq, embed_dim), dtype=jnp.float32)
    weight = jax.random.normal(kw, (vocab_size, embed_dim), dtype=jnp.float32)
    bias = jnp.zeros((vocab_size,), dtype=jnp.float32)

    w_t, b_row = prepare_head_params(weight, bias)          # one-time prep
    y = jax.block_until_ready(expandable_linear_head_forward(x, w_t, b_row))

    x_bf = x.astype(jnp.bfloat16).astype(jnp.float32)
    w_bf = weight.astype(jnp.bfloat16).astype(jnp.float32)
    ref_bf16 = x_bf @ w_bf.T + bias
    ref_f32 = x @ weight.T + bias
    assert y.shape == (batch, seq, vocab_size)
    assert jnp.allclose(y, ref_bf16, atol=2e-3, rtol=2e-3)
    assert jnp.allclose(y, ref_f32, atol=1e-1, rtol=5e-2)

    # ---- 2) multi-tile grid with masked partial trailing M/V blocks --------
    #  M = 30 -> tiles of 16 (last masked); V = 200 -> tiles of 128 (last
    #  masked).  No explicit padding anywhere; nonzero bias exercised.
    x2 = jax.random.normal(kx2, (3, 10, embed_dim), dtype=jnp.float32)
    w2 = jax.random.normal(kw2, (200, embed_dim), dtype=jnp.float32)
    b2 = 0.1 * jnp.arange(200, dtype=jnp.float32)
    y2 = jax.block_until_ready(
        expandable_linear_head(x2, w2, b2, tm=16, tn=128))
    ref2 = (x2.astype(jnp.bfloat16).astype(jnp.float32)
            @ w2.astype(jnp.bfloat16).astype(jnp.float32).T + b2)
    assert y2.shape == (3, 10, 200)
    assert jnp.allclose(y2, ref2, atol=2e-3, rtol=2e-3)

    # ---- 3) forced K-split path (E split into two 128-wide chunks) ---------
    embed3, vocab3 = 256, 384
    x3 = jax.random.normal(kx3, (4, 6, embed3), dtype=jnp.float32)   # M = 24
    w3 = jax.random.normal(kw3, (vocab3, embed3), dtype=jnp.float32)
    b3 = jnp.ones((vocab3,), dtype=jnp.float32)
    w3_t, b3_row = prepare_head_params(w3, b3)
    y3 = jax.block_until_ready(
        expandable_linear_head_forward(x3, w3_t, b3_row, tm=16, tn=128, tk=128))
    ref3 = (x3.astype(jnp.bfloat16).astype(jnp.float32)
            @ w3.astype(jnp.bfloat16).astype(jnp.float32).T + b3)
    assert y3.shape == (4, 6, vocab3)
    assert jnp.allclose(y3, ref3, atol=5e-3, rtol=5e-3)

    print("KERNEL_OK")
</pallas_src>

<mosaic_0001>
module attributes {stable_mosaic.version = 11 : i64} {
  func.func @_head_kernel(%arg0: i32, %arg1: i32, %arg2: i32, %arg3: memref<16x32xbf16, #tpu.memory_space<vmem>>, %arg4: memref<32x256xbf16, #tpu.memory_space<vmem>>, %arg5: memref<1x256xf32, #tpu.memory_space<vmem>>, %arg6: memref<16x256xf32, #tpu.memory_space<vmem>>) attributes {dimension_semantics = [#tpu.dimension_semantics<parallel>, #tpu.dimension_semantics<arbitrary>, #tpu.dimension_semantics<arbitrary>], iteration_bounds = array<i64: 1, 1, 1>, scalar_prefetch = 0 : i64, scratch_operands = 0 : i64, tpu.core_type = #tpu.core_type<tc>, window_params = [{transform_indices = @transform_0, window_bounds = array<i64: 16, 32>}, {transform_indices = @transform_1, window_bounds = array<i64: 32, 256>}, {transform_indices = @transform_2, window_bounds = array<i64: 1, 256>}, {transform_indices = @transform_3, window_bounds = array<i64: 16, 256>}]} {
    %c0 = arith.constant 0 : index
    %c0_0 = arith.constant 0 : index
    %0 = vector.load %arg3[%c0, %c0_0] : memref<16x32xbf16, #tpu.memory_space<vmem>>, vector<16x32xbf16>
    %c0_1 = arith.constant 0 : index
    %c0_2 = arith.constant 0 : index
    %1 = vector.load %arg4[%c0_1, %c0_2] : memref<32x256xbf16, #tpu.memory_space<vmem>>, vector<32x256xbf16>
    %cst = arith.constant dense<0.000000e+00> : vector<16x256xf32>
    %2 = tpu.matmul %0, %1, %cst {dimension_numbers = #tpu.dot_dimension_numbers<[1], [0], [0], [1], [0, 0, 1, 1], [], []>} : vector<16x32xbf16>, vector<32x256xbf16>, vector<16x256xf32> -> vector<16x256xf32>
    %c0_3 = arith.constant 0 : index
    %c0_4 = arith.constant 0 : index
    %3 = vector.load %arg5[%c0_3, %c0_4] : memref<1x256xf32, #tpu.memory_space<vmem>>, vector<1x256xf32>
    %4 = vector.broadcast %3 : vector<1x256xf32> to vector<16x256xf32>
    %5 = arith.addf %2, %4 : vector<16x256xf32>
    %c0_5 = arith.constant 0 : index
    %c0_6 = arith.constant 0 : index
    %6 = vector.load %arg6[%c0_5, %c0_6] : memref<16x256xf32, #tpu.memory_space<vmem>>, vector<16x256xf32>
    tpu.vector_store %arg6[%c0_5, %c0_6], %5 {strides = array<i32>} : memref<16x256xf32, #tpu.memory_space<vmem>>, vector<16x256xf32>,
    return
  }
  func.func @transform_0(%arg0: i32, %arg1: i32, %arg2: i32) -> (i32, i32) {
    %c0_i32 = arith.constant 0 : i32
    return %arg1, %arg2 : i32, i32
  }
  func.func @transform_1(%arg0: i32, %arg1: i32, %arg2: i32) -> (i32, i32) {
    %c0_i32 = arith.constant 0 : i32
    return %arg2, %arg0 : i32, i32
  }
  func.func @transform_2(%arg0: i32, %arg1: i32, %arg2: i32) -> (i32, i32) {
    %c0_i32 = arith.constant 0 : i32
    %c0_i32_0 = arith.constant 0 : i32
    return %c0_i32, %arg0 : i32, i32
  }
  func.func @transform_3(%arg0: i32, %arg1: i32, %arg2: i32) -> (i32, i32) {
    %c0_i32 = arith.constant 0 : i32
    return %arg1, %arg0 : i32, i32
  }
}

</mosaic_0001>

<bundles_post_ra>
// kernel: expandable_linear_head_forward.1
= control target key start
LH: loop header
LB: loop body
LE: loop exit
PB: predicated region body
PF: predicated region fallthrough
CT: control target
= control target key end

     0   :  { %8 = vsyncpa [#allocation3], 0  ;;  %s244_s0 = inlined_call_operand.vmem [shape: bf16[16,32], index: 0, kind: input, shape index: {}]   ;;  %s245_s1 = inlined_call_operand.hbm [shape: bf16[32,256], index: 1, kind: input, shape index: {}]   ;;  %s246_s2 = inlined_call_operand.vmem [shape: f32[1,256], index: 2, kind: input, shape index: {}]   ;;  %s247_s3 = inlined_call_operand.hbm [shape: f32[16,256], index: 3, kind: output, shape index: {}]  }
   0x1   :  { %9 = vsyncpa [#allocation4], 0  ;;  %s205_s12 = smov [#allocation2]  }
   0x2   :  { %s17_s13 = sshll.u32 %s205_s12, 4  ;;  %s18_s13 = int_to_ptr.vmem [resolvable:$true] %s17_s13 }
   0x3   :  { %s169_s14 = scalar_lea.vmem %s18_s13, 512  ;;  %p174_p1 = scmp.lt.s32.totalorder %s18_s13, %s18_s13 }
   0x4   :  { %p170_p0 = scmp.ne.s32.totalorder %s18_s13, %s169_s14  ;;  %p175_p2 = scmp.lt.s32.totalorder %s169_s14, %s169_s14 }
   0x6   :  { %p176_p3 = por %p175_p2, %p174_p1 }
   0x8   :  { %p177_p4 = pnand %p176_p3, %p170_p0 }
   0xa   :  { %180 = shalt.err (!%p177_p4)
}
   0xb   :  { %s206_s15 = smov 128   ;;  %s207_s16 = smov 8  }
   0xc   :  { %23 = dma.hbm_to_vmem [thread:$0]  %s245_s1, 512, %s18_s13, [#allocation3], %s206_s15, %s206_s15, %s207_s16  }
   0xd   :  { %201 = dma.done.wait [#allocation3], 512  }
   0xe   :  { %202 = vsyncadd [#allocation3], 4294966784  ;;  %v208_v0 = vmov 0   ;;  %v154_v1 = vld [vmem:[#allocation2 + $0x14] ss:$8 sps:$4 sm:$0xff]   ;;  %v160_v5 = vld [vmem:[%s244_s0] sm:$0xff]   ;;  %v38_v6 = vlaneseq }
   0xf   :  { %109 = vmatprep.mubr.bf16.mxu0 %v208_v0  ;;  %v156_v2 = vld [vmem:[#allocation2 + $0x10] ss:$8 sps:$4 sm:$0xff]   ;;  %89 = vmatprep.subr.bf16.mxu0 %v154_v1  ;;  %v157_v3 = vld [vmem:[#allocation2 + $0x4] ss:$8 sps:$4 sm:$0xff]   ;;  %v159_v4 = vld [vmem:[#allocation2] ss:$8 sps:$4 sm:$0xff]  }
  0x10   :  { %90 = vmatpush1.bf16.msra.mxu0 %v156_v2  ;;  %vm73_vm0 = vcmask 261120   ;;  %v39_v7 = vshrl.u32 %v38_v6, 7  ;;  %v36_v9 = vld [vmem:[%s246_s2] sm:$0x3]  ;;  %s209_s22 = smov [#allocation5]  }
  0x11   :  { %91 = vmatprep.subr.bf16.mxu0 %v157_v3  ;;  %s129_s0 = sshll.u32 %s209_s22, 4  ;;  %s130_s0 = int_to_ptr.vmem [resolvable:$true] %s129_s0 }
  0x12   :  { %v40_v8 = vsub.s32 0, %v39_v7  ;;  %v44_v10 = vsub.s32 1, %v39_v7  ;;  %s181_s23 = scalar_lea.vmem %s130_s0, 512  ;;  %p186_p6 = scmp.lt.s32.totalorder %s130_s0, %s130_s0 }
  0x13   :  { %p182_p5 = scmp.ne.s32.totalorder %s130_s0, %s181_s23  ;;  %p187_p7 = scmp.lt.s32.totalorder %s181_s23, %s181_s23 }
  0x14   :  { %92 = vmatpush1.bf16.msra.mxu0 %v159_v4  ;;  %v41_v11 = vrot.slane %v36_v9, %v40_v8  ;;  %v45_v12 = vrot.slane %v36_v9, %v44_v10 }
  0x15   :  { %p188_p8 = por %p187_p7, %p186_p6 }
  0x17   :  { %146 = vmatmul.mubr.msk.bf16.vlgmr.msra.gmra.mxu0 %vm73_vm0, %v160_v5  ;;  %p189_p9 = pnand %p188_p8, %p182_p5 }
  0xd7   :  { %v111_v13 = vpop.f32.mrf.mxu0 }
  0xd8   :  { %v112_v14 = vadd.f32 %v111_v13, %v41_v11 }
  0xd9   :  { %v113_v15 = vpop.f32.mrf.mxu0 }
  0xda   :  { %120 = vst [vmem:[#allocation5] sm:$0xff] %v112_v14  ;;  %v114_v16 = vadd.f32 %v113_v15, %v45_v12 }
  0xdb   :  { %v115_v17 = vpop.f32.mrf.mxu0 }
  0xdc   :  { %121 = vst [vmem:[#allocation5 + $0x8] sm:$0xff] %v114_v16  ;;  %v116_v18 = vadd.f32 %v115_v17, %v41_v11 }
  0xdd   :  { %v117_v19 = vpop.f32.mrf.mxu0 }
  0xde   :  { %122 = vst [vmem:[#allocation5 + $0x10] sm:$0xff] %v116_v18  ;;  %v118_v20 = vadd.f32 %v117_v19, %v45_v12 }
  0xe0   :  { %123 = vst [vmem:[#allocation5 + $0x18] sm:$0xff] %v118_v20 }
  0xe1   :  { %192 = shalt.err (!%p189_p9)
}
  0xe2   :  { %s210_s2 = smov 256   ;;  %s211_s24 = smov 16  }
  0xe3   :  { %135 = dma.vmem_to_hbm [thread:$0]  %s130_s0, 512, %s247_s3, [#allocation4], %s210_s2, %s210_s2, %s211_s24  }
  0xe4   :  { %203 = dma.done.wait [#allocation4], 512  }
  0xe5   :  { %204 = vsyncadd [#allocation4], 4294966784 }
  0xe6   :  { %139 = vsyncpa [#allocation3], 1 }
  0xe7   :  { %140 = vsyncpa [#allocation4], 1 }

</bundles_post_ra>
